<compile_context>
chip_gen: v6e
topology: v6e:2x2x1
jax: 0.10.0
libtpu: 0.0.40
codegen_flags: <defaults>
</compile_context>

<pallas_src>
import jax
import jax.numpy as jnp
from jax.experimental import pallas as pl
from jax.experimental.pallas import tpu as pltpu


def _up_kernel(x_ref, w_ref, b_ref, a_ref, o_ref):
    # x_ref: (C_in, T)    w_ref: (C_out, C_in)    b_ref: (C_out, 1)
    # a_ref: (1, 1) in SMEM (single shared PReLU slope)
    # o_ref: (C_out, T)
    y = jnp.dot(w_ref[...], x_ref[...], preferred_element_type=jnp.float32)
    y = y + b_ref[...]                       # broadcast bias over the lane dim
    a = a_ref[0, 0]
    o_ref[...] = jnp.where(y > 0, y, a * y).astype(o_ref.dtype)


def _choose_tile_hw(hw, max_tile=2048):
    """Largest lane-aligned spatial tile (multiple of 128) up to max_tile."""
    if hw <= 128:
        return hw                            # full extent (always legal)
    t = min(hw, max_tile)
    return (t // 128) * 128


def conv1x1_prelu_nchw(x_nc_hw, w, b, alpha, *, tile_hw=None):
    """Fused 1x1-conv + PReLU in NCHW layout.

    x_nc_hw: (N, C_in, HW)   w: (C_out, C_in)   b: (C_out, 1)   alpha: (1, 1)
    returns: (N, C_out, HW) float32
    """
    N, C_in, HW = x_nc_hw.shape
    C_out = w.shape[0]
    if tile_hw is None:
        tile_hw = _choose_tile_hw(HW)
    n_hw_tiles = pl.cdiv(HW, tile_hw)

    itemsize = jnp.dtype(x_nc_hw.dtype).itemsize
    # double-buffered input + output tiles, resident weights/bias, headroom
    vmem_bytes = (2 * (C_in * tile_hw * itemsize + C_out * tile_hw * 4)
                  + C_out * C_in * itemsize + C_out * 4 + (8 << 20))
    vmem_bytes = int(max(vmem_bytes, 32 << 20))

    cost = pl.CostEstimate(
        flops=2 * N * HW * C_in * C_out,
        transcendentals=0,
        bytes_accessed=(N * HW * C_in * itemsize          # activations in
                        + N * HW * C_out * 4              # activations out
                        + C_in * C_out * itemsize),       # weights
    )

    return pl.pallas_call(
        _up_kernel,
        out_shape=jax.ShapeDtypeStruct((N, C_out, HW), jnp.float32),
        grid_spec=pltpu.PrefetchScalarGridSpec(
            num_scalar_prefetch=0,
            grid=(N, n_hw_tiles),
            in_specs=[
                # activation tile: (C_in, tile_hw), batch dim squeezed out
                pl.BlockSpec((None, C_in, tile_hw), lambda n, t: (n, 0, t)),
                # weights / bias: constant block -> stays resident in VMEM
                pl.BlockSpec((C_out, C_in), lambda n, t: (0, 0)),
                pl.BlockSpec((C_out, 1), lambda n, t: (0, 0)),
                # PReLU slope: scalar in SMEM
                pl.BlockSpec((1, 1), lambda n, t: (0, 0),
                             memory_space=pltpu.SMEM),
            ],
            out_specs=pl.BlockSpec((None, C_out, tile_hw),
                                   lambda n, t: (n, 0, t)),
        ),
        compiler_params=pltpu.CompilerParams(
            dimension_semantics=("parallel", "parallel"),
            vmem_limit_bytes=vmem_bytes,
        ),
        cost_estimate=cost,
    )(x_nc_hw, w, b, alpha)


def pixel_shuffle_2(x_nchw):
    # PyTorch PixelShuffle(r=2): out[n, c, h*2+i, w*2+j] = in[n, c*4 + i*2 + j, h, w]
    N, C, H, W = x_nchw.shape
    r = 2
    y = x_nchw.reshape(N, C // (r * r), r, r, H, W)
    y = jnp.transpose(y, (0, 1, 4, 2, 5, 3))      # (N, C/4, H, r, W, r)
    return y.reshape(N, C // (r * r), H * r, W * r)


def up_forward(x_nchw, w_conv, b_conv, alpha, *, compute_dtype=jnp.float32):
    """Full _up.forward in NCHW.

    x_nchw: (N, C, H, W); w_conv: (C_out, C_in) (1x1 kernel squeezed);
    b_conv: (C_out,); alpha: scalar PReLU parameter.
    compute_dtype: jnp.bfloat16 recommended on v6e/v7x for large C
                   (f32 accumulation is kept either way).
    """
    N, C, H, W = x_nchw.shape
    x_flat = x_nchw.reshape(N, C, H * W).astype(compute_dtype)
    w_mat = w_conv.astype(compute_dtype)                    # (C_out, C_in)
    b_mat = b_conv.reshape(-1, 1).astype(jnp.float32)       # (C_out, 1)
    a_mat = jnp.asarray(alpha, jnp.float32).reshape(1, 1)

    y = conv1x1_prelu_nchw(x_flat, w_mat, b_mat, a_mat)     # (N, C_out, HW)
    y = y.reshape(N, -1, H, W)
    return pixel_shuffle_2(y)


if __name__ == "__main__":
    key = jax.random.PRNGKey(0)
    k_x, k_w, k_b = jax.random.split(key, 3)

    N, C, H, W = 2, 4, 16, 16          # channel_in = 4 (divisible by 4 for shuffle)
    x = jax.random.normal(k_x, (N, C, H, W), dtype=jnp.float32)

    # Deterministic parameter init (synthetic; matches Conv2d(C, C, 1) shapes).
    w_conv = jax.random.normal(k_w, (C, C), dtype=jnp.float32) * 0.1   # (C_out, C_in)
    b_conv = jax.random.normal(k_b, (C,), dtype=jnp.float32) * 0.1
    alpha = 0.25                                                       # PReLU default

    out = up_forward(x, w_conv, b_conv, alpha)
    out = jax.block_until_ready(out)

    # Pure-JAX reference for sanity.
    y_ref = jnp.einsum("nchw,oc->nohw", x, w_conv) + b_conv[None, :, None, None]
    y_ref = jnp.where(y_ref > 0, y_ref, alpha * y_ref)
    ref = pixel_shuffle_2(y_ref)

    assert out.shape == (N, C // 4, 2 * H, 2 * W), out.shape
    assert jnp.allclose(out, ref, atol=1e-5, rtol=1e-5)

    print("KERNEL_OK")
</pallas_src>

<mosaic_0001>
module attributes {stable_mosaic.version = 11 : i64} {
  func.func @_up_kernel(%arg0: i32, %arg1: i32, %arg2: memref<1x4x256xf32, #tpu.memory_space<vmem>>, %arg3: memref<4x4xf32, #tpu.memory_space<vmem>>, %arg4: memref<4x1xf32, #tpu.memory_space<vmem>>, %arg5: memref<1x1xf32, #tpu.memory_space<smem>>, %arg6: memref<1x4x256xf32, #tpu.memory_space<vmem>>) attributes {dimension_semantics = [#tpu.dimension_semantics<parallel>, #tpu.dimension_semantics<parallel>], iteration_bounds = array<i64: 2, 1>, scalar_prefetch = 0 : i64, scratch_operands = 0 : i64, tpu.core_type = #tpu.core_type<tc>, window_params = [{transform_indices = @transform_0, window_bounds = array<i64: 1, 4, 256>}, {pipeline_mode = #tpu.pipeline_mode<synchronous>, transform_indices = @transform_1, window_bounds = array<i64: 4, 4>}, {pipeline_mode = #tpu.pipeline_mode<synchronous>, transform_indices = @transform_2, window_bounds = array<i64: 4, 1>}, {transform_indices = @transform_3, window_bounds = array<i64: 1, 1>}, {transform_indices = @transform_4, window_bounds = array<i64: 1, 4, 256>}]} {
    %c0 = arith.constant 0 : index
    %c0_0 = arith.constant 0 : index
    %0 = vector.load %arg3[%c0, %c0_0] : memref<4x4xf32, #tpu.memory_space<vmem>>, vector<4x4xf32>
    %c0_1 = arith.constant 0 : index
    %c0_2 = arith.constant 0 : index
    %c0_3 = arith.constant 0 : index
    %1 = vector.load %arg2[%c0_1, %c0_2, %c0_3] : memref<1x4x256xf32, #tpu.memory_space<vmem>>, vector<1x4x256xf32>
    %2 = vector.shape_cast %1 : vector<1x4x256xf32> to vector<4x256xf32>
    %cst = arith.constant dense<0.000000e+00> : vector<4x256xf32>
    %3 = tpu.matmul %0, %2, %cst {dimension_numbers = #tpu.dot_dimension_numbers<[1], [0], [0], [1], [0, 0, 1, 1], [], []>} : vector<4x4xf32>, vector<4x256xf32>, vector<4x256xf32> -> vector<4x256xf32>
    %c0_4 = arith.constant 0 : index
    %c0_5 = arith.constant 0 : index
    %4 = vector.load %arg4[%c0_4, %c0_5] : memref<4x1xf32, #tpu.memory_space<vmem>>, vector<4x1xf32>
    %5 = vector.broadcast %4 : vector<4x1xf32> to vector<4x256xf32>
    %6 = arith.addf %3, %5 : vector<4x256xf32>
    %c0_6 = arith.constant 0 : index
    %c0_7 = arith.constant 0 : index
    %7 = memref.load %arg5[%c0_6, %c0_7] : memref<1x1xf32, #tpu.memory_space<smem>>
    %cst_8 = arith.constant 0.000000e+00 : f32
    %8 = vector.broadcast %cst_8 : f32 to vector<4x256xf32>
    %9 = arith.cmpf ogt, %6, %8 : vector<4x256xf32>
    %10 = vector.broadcast %7 : f32 to vector<4x256xf32>
    %11 = arith.mulf %10, %6 : vector<4x256xf32>
    %12 = arith.select %9, %6, %11 : vector<4x256xi1>, vector<4x256xf32>
    %c0_9 = arith.constant 0 : index
    %c0_10 = arith.constant 0 : index
    %c0_11 = arith.constant 0 : index
    %13 = vector.load %arg6[%c0_9, %c0_10, %c0_11] : memref<1x4x256xf32, #tpu.memory_space<vmem>>, vector<1x4x256xf32>
    %14 = vector.shape_cast %13 : vector<1x4x256xf32> to vector<4x256xf32>
    %15 = vector.shape_cast %12 : vector<4x256xf32> to vector<1x4x256xf32>
    tpu.vector_store %arg6[%c0_9, %c0_10, %c0_11], %15 {strides = array<i32>} : memref<1x4x256xf32, #tpu.memory_space<vmem>>, vector<1x4x256xf32>,
    return
  }
  func.func @transform_0(%arg0: i32, %arg1: i32) -> (i32, i32, i32) {
    %c0_i32 = arith.constant 0 : i32
    %c0_i32_0 = arith.constant 0 : i32
    return %arg0, %c0_i32, %arg1 : i32, i32, i32
  }
  func.func @transform_1(%arg0: i32, %arg1: i32) -> (i32, i32) {
    %c0_i32 = arith.constant 0 : i32
    %c0_i32_0 = arith.constant 0 : i32
    %c0_i32_1 = arith.constant 0 : i32
    return %c0_i32, %c0_i32_0 : i32, i32
  }
  func.func @transform_2(%arg0: i32, %arg1: i32) -> (i32, i32) {
    %c0_i32 = arith.constant 0 : i32
    %c0_i32_0 = arith.constant 0 : i32
    %c0_i32_1 = arith.constant 0 : i32
    return %c0_i32, %c0_i32_0 : i32, i32
  }
  func.func @transform_3(%arg0: i32, %arg1: i32) -> (i32, i32) {
    %c0_i32 = arith.constant 0 : i32
    %c0_i32_0 = arith.constant 0 : i32
    %c0_i32_1 = arith.constant 0 : i32
    return %c0_i32, %c0_i32_0 : i32, i32
  }
  func.func @transform_4(%arg0: i32, %arg1: i32) -> (i32, i32, i32) {
    %c0_i32 = arith.constant 0 : i32
    %c0_i32_0 = arith.constant 0 : i32
    return %arg0, %c0_i32, %arg1 : i32, i32, i32
  }
}

</mosaic_0001>

<bundles_post_ra>
// kernel: tpu_custom_call.1
= control target key start
LH: loop header
LB: loop body
LE: loop exit
PB: predicated region body
PF: predicated region fallthrough
CT: control target
= control target key end

     0   :  { %s811_s0 = inlined_call_operand.hbm [shape: f32[2,4,256], index: 0, kind: input, shape index: {}]   ;;  %s812_s1 = inlined_call_operand.vmem [shape: f32[4,4], index: 1, kind: input, shape index: {}]   ;;  %s813_s2 = inlined_call_operand.vmem [shape: f32[4,1], index: 2, kind: input, shape index: {}]   ;;  %s814_s3 = inlined_call_operand.<no memory space> [shape: f32[1,1], index: 3, kind: input, shape index: {}]   ;;  %s815_s4 = inlined_call_operand.hbm [shape: f32[2,4,256], index: 4, kind: output, shape index: {}]  }
   0x1   :  { %9 = sst [smem:[#allocation2]] %s814_s3 }
   0x2   :  { %10 = vsyncpa [#allocation4], 0 }
   0x3   :  { %12 = vsyncpa [#allocation4 + $0x1], 0 }
   0x4   :  { %13 = vsyncpa [#allocation5], 0 }
   0x5   :  { %15 = vsyncpa [#allocation5 + $0x1], 0  ;;  %s667_s17 = smov 0   ;;  %s669_s18 = smov 0  }
   0x6   :  { %s671_s19 = smov 0   ;;  %s673_s20 = smov 0  }
   0x7   :  { %s675_s21 = smov 0   ;;  %s677_s22 = smov 0  }
   0x8 LB: > { %s439_s3 = sadd.s32 4294967295, %s633_s22   ;;  %s440_s23 = sadd.s32 4294967294, %s633_s22   ;;  %s633_s22 = sphi %s677_s22, %s21_s22   ;;  %s629_s21 = sphi %s675_s21, %s827_s21   ;;  %s625_s20 = sphi %s673_s20, %s826_s20   ;;  %s621_s19 = sphi %s671_s19, %s825_s19   ;;  %s617_s18 = sphi %s669_s18, %s824_s18   ;;  %s613_s17 = sphi %s667_s17, %s823_s17  }
   0x9   : > { %s33_s24 = sadd.s32 1, %s629_s21  ;;  %s42_s25 = sadd.s32 1, %s621_s19 }
   0xa   : > { %p35_p0 = scmp.ge.s32.totalorder %s33_s24, 2  ;;  %p49_p1 = scmp.ne.s32.totalorder %s621_s19, %s617_s18 }
   0xb   : > { %p50_p2 = scmp.eq.s32.totalorder %s633_s22, 0  ;;  %p55_p3 = scmp.ne.s32.totalorder %s617_s18, %s613_s17 }
   0xc   : > { %s829_s24 = smov (%p35_p0, %s33_s24), 0  ;;  %p56_p5 = scmp.eq.s32.totalorder %s439_s3, 0 }
   0xd   : > { %p708_p4 = por %p50_p2, %p49_p1  ;;  %s37_s27 = ssub.s32 %s629_s21, %s829_s24 }
   0xe   : > { %p144_p6 = scmp.eq.s32.totalorder %s439_s3, 1  ;;  %p40_p7 = scmp.eq.s32.totalorder %s37_s27, 0 }
   0xf   : > { %p714_p8 = por %p56_p5, %p55_p3  ;;  %p150_p10 = scmp.eq.s32.totalorder %s440_s23, 1 }
  0x10   : > { %p718_p9 = por %p144_p6, %p49_p1  ;;  %p471_p13 = scmp.lt.s32.totalorder %s633_s22, 2 }
  0x11   : > { %s723_s30 = scalar_select %p40_p7, %s621_s19, %s42_s25  }
  0x12   : > { %p725_p11 = por %p150_p10, %p55_p3  ;;  %s179_s6 = sand.u32 1, %s621_s19  }
  0x13   : > { %s443_s7 = sshll.u32 %s179_s6, 3  ;;  %s457_s8 = sshll.u32 %s629_s21, 7 }
  0x14   : > { %s819_s5 = scalar_select %p725_p11, 1, 0 }
  0x15   : > { %s191_s11 = scalar_lea.hbm %s811_s0, %s457_s8  ;;  %s183_s12 = scalar_lea.vmem [#allocation3], %s443_s7 }
  0x16   : > { %s193_s13 = sshll.u32 %s183_s12, 4  ;;  %p738_p0 = pnand %p471_p13, %p708_p4  ;;  %s194_s13 = int_to_ptr.vmem [resolvable:$true] %s193_s13 }
  0x17   : > { %p446_p1 = scmp.ge.s32.totalorder %s633_s22, 1  ;;  %p198_p2 = scmp.lt.s32.totalorder %s633_s22, 3 }
  0x18   : > { %s180_s15 = scalar_lea.sflag [#allocation4], %s179_s6  ;;  %p527_p3 = pneg %p738_p0 }
  0x19   : > { %s538_s16 = scalar_lea.vmem %s194_s13, 128  ;;  %s635_s3 = smov [#allocation3]  }
  0x1a   : > { %p539_p5 = scmp.ne.s32.totalorder %s194_s13, %s538_s16  ;;  %s543_s23 = sshll.u32 %s635_s3, 4  ;;  %s544_s23 = int_to_ptr.vmem [resolvable:$false] %s543_s23 }
  0x1b   : > { %s545_s25 = scalar_lea.vmem %s544_s23, 256  ;;  %p546_p10 = scmp.lt.s32.totalorder %s194_s13, %s544_s23 }
  0x1c   : > { %p541_p6 = pnand %p539_p5, %p527_p3  ;;  %p547_p12 = scmp.lt.s32.totalorder %s545_s25, %s538_s16 }
  0x1e   : > { %p542_p7 = pneg %p541_p6  ;;  %p548_p4 = por %p547_p12, %p546_p10 }
  0x20   : > { %p549_p13 = pnand %p548_p4, %p542_p7 }
  0x22   : > { %552 = shalt.err (!%p549_p13)
}
  0x23   : > { %466 = dma.hbm_to_vmem [thread:$0]  (!%p738_p0), %s191_s11, 128, %s194_s13, %s180_s15  }
  0x24   : > { %p199_p11 = pnand %p446_p1, %p198_p2 }
  0x25   : > { %s753_s26 = sand.u32 (!%p199_p11), 1, %s617_s18  }
  0x26   : > { %202 = sbr.rel (%p199_p11) target bundleno = 264 (0x108), region = 36  ;;  %s447_s27 = sshll.u32 (!%p199_p11), %s753_s26, 3 }
  0x27   : > { %s205_s6 = scalar_lea.sflag (!%p199_p11), [#allocation4], %s753_s26  ;;  %s208_s7 = scalar_lea.vmem (!%p199_p11), [#allocation3], %s447_s27 }
  0x2b   : > { %604 = dma.done.wait (%p714_p8), %s205_s6, 128  }
  0x2c   : > { %606 = vsyncadd (%p714_p8), %s205_s6, 4294967168  ;;  %v636_v0 = vmov 0.0   ;;  %v637_v1 = vmov 0   ;;  %v236_v2 = vld [vmem:[%s208_s7] sm:$0xff]  ;;  %vm249_vm0 = vcmask 1043456   ;;  %vm245_vm1 = vcmask 31744  }
  0x2d   : > { %318 = vmatprep.mubr.f32.mxu0 %v636_v0  ;;  %523 = vset.pattern.permute.xlu0 %v637_v1  ;;  %v237_v3 = vld [vmem:[%s813_s2] sm:$0xf]  ;;  %v244_v4 = vcombine.high %v236_v2, %v236_v2  ;;  %s325_s28 = sld [smem:[#allocation2]]  ;;  %s458_s12 = sshll.u32 %s625_s20, 7 }
  0x2e   : > { %240 = vperm.xlu0 %523, %v237_v3   ;;  %v235_v5 = vld [vmem:[%s812_s1] sm:$0xf]  ;;  %s232_s13 = scalar_lea.vmem [#allocation6], %s447_s27  ;;  %s353_s3 = scalar_lea.hbm %s815_s4, %s458_s12 }
  0x2f   : > { %449 = vmatprep.subr.msk.mxu0 %vm249_vm0, %v244_v4  ;;  %s355_s14 = sshll.u32 %s232_s13, 4  ;;  %s339_s23 = scalar_lea.sflag [#allocation5], %s753_s26  ;;  %s356_s14 = int_to_ptr.vmem [resolvable:$true] %s355_s14 }
  0x30   : > { %450 = vmatpush1.msk.msra.mxu0 %vm249_vm0, %v236_v2  ;;  %s553_s25 = scalar_lea.vmem %s356_s14, 128  ;;  %s638_s6 = smov [#allocation6]  }
  0x31   : > { %451 = vmatmul.mubr.msk.f32.vlgmr.msra.gmra.mxu0 %vm245_vm1, %v235_v5  ;;  %p554_p8 = scmp.ne.s32.totalorder %s356_s14, %s553_s25  ;;  %s557_s20 = sshll.u32 %s638_s6, 4  ;;  %s558_s20 = int_to_ptr.vmem [resolvable:$false] %s557_s20 }
  0x32   : > { %s559_s27 = scalar_lea.vmem %s558_s20, 256  ;;  %p560_p0 = scmp.lt.s32.totalorder %s356_s14, %s558_s20 }
  0x33   : > { %v328_v8 = vstv %s325_s28  ;;  %p555_p11 = pnand %p554_p8, %p718_p9  ;;  %p561_p1 = scmp.lt.s32.totalorder %s559_s27, %s553_s25 }
  0x35   : > { %p556_p12 = pneg %p555_p11  ;;  %p562_p2 = por %p561_p1, %p560_p0 }
  0x37   : > { %p563_p3 = pnand %p562_p2, %p556_p12 }
  0xa9   : > { %v241_v6 = vpop.permute.xlu0 %240 }
  0xf1   : > { %v320_v7 = vpop.f32.mrf.mxu0 }
  0xf2   : > { %v321_v9 = vadd.f32 %v320_v7, %v241_v6 }
  0xf3   : > { %v322_v10 = vpop.f32.mrf.mxu0 }
  0xf4   : > { %v329_v11 = vmul.f32 %v328_v8, %v321_v9  ;;  %v323_v12 = vadd.f32 %v322_v10, %v241_v6  ;;  %vm326_vm2 = vcmp.gt.f32.partialorder %v321_v9, 0.0 }
  0xf6   : > { %vm327_vm3 = vcmp.gt.f32.partialorder %v323_v12, 0.0  ;;  %v330_v13 = vmul.f32 %v328_v8, %v323_v12  ;;  %v331_v14 = vsel %vm326_vm2, %v321_v9, %v329_v11 }
  0xf8   : > { %v332_v15 = vsel %vm327_vm3, %v323_v12, %v330_v13 }
  0xf9   : > { %v335_v16 = vcombine.low %v331_v14, %v332_v15 }
  0xfb   : > { %337 = vst [vmem:[%s232_s13] sm:$0xff] %v335_v16 }
  0xfc   : > { %566 = shalt.err (!%p563_p3)
}
  0xfd   : > { %s567_s7 = scalar_lea.hbm %s353_s3, 128  ;;  %s571_s9 = scalar_lea.hbm %s815_s4, 256 }
  0xfe   : > { %p568_p5 = scmp.ne.s32.totalorder %s353_s3, %s567_s7  ;;  %p572_p10 = scmp.lt.s32.totalorder %s353_s3, %s815_s4 }
  0xff   : > { %p573_p4 = scmp.lt.s32.totalorder %s571_s9, %s567_s7 }
 0x100   : > { %p569_p6 = pnand %p568_p5, %p718_p9 }
 0x101   : > { %p574_p13 = por %p573_p4, %p572_p10 }
 0x102   : > { %p570_p7 = pneg %p569_p6 }
 0x104   : > { %p575_p8 = pnand %p574_p13, %p570_p7 }
 0x106   : > { %578 = shalt.err (!%p575_p8)
}
 0x107   : > { %461 = dma.vmem_to_hbm [thread:$0]  (%p718_p9), %s356_s14, 128, %s353_s3, %s339_s23  }
 0x108 PF: > { %s367_s28 = sand.u32 1, %s613_s17   ;;  %p821_p11 = scmp.ne.s32.totalorder %s819_s5, 0 }
 0x109   : > { %p822_p12 = scmp.ge.s32.totalorder %s633_s22, 2  ;;  %s368_s12 = scalar_lea.sflag [#allocation5], %s367_s28 }
 0x10b   : > { %p468_p0 = pnand %p822_p12, %p821_p11 }
 0x10d   : > { %p469_p1 = pneg %p468_p0 }
 0x10f   : > { %608 = dma.done.wait (%p469_p1), %s368_s12, 128  }
 0x110   : > { %610 = vsyncadd (%p469_p1), %s368_s12, 4294967168  ;;  %s21_s22 = sadd.s32 1, %s633_s22   ;;  %s823_s17 = smov %s617_s18 }
 0x111   : > { %p18_p2 = scmp.ge.s32.totalorder %s21_s22, 4   ;;  %s824_s18 = smov %s621_s19 }
 0x112   : > { %s825_s19 = smov %s723_s30  ;;  %s826_s20 = smov %s629_s21 }
 0x113   : > { %s827_s21 = smov %s829_s24  ;;  %20 = sbr.rel (!%p18_p2) target bundleno = 8 (0x8), region = 81 }
 0x118   :  { %373 = vsyncpa [#allocation4], 1 }
 0x119   :  { %375 = vsyncpa [#allocation4 + $0x1], 1 }
 0x11a   :  { %376 = vsyncpa [#allocation5], 1 }
 0x11b   :  { %378 = vsyncpa [#allocation5 + $0x1], 1 }

</bundles_post_ra>
